<compile_context>
chip_gen: v6e
topology: v6e:2x2x1
jax: 0.10.0
libtpu: 0.0.40
codegen_flags: <defaults>
</compile_context>

<pallas_src>
import math
import functools

import jax
import jax.numpy as jnp
from jax.experimental import pallas as pl
from jax.experimental.pallas import tpu as pltpu

BN_EPS = 1e-5
LANE = 128


def _round_up(x, m):
    return (x + m - 1) // m * m


# --------------------------------------------------------------------------------
# Phase 1: binary conv (im2col matmul on the MXU) + per-tile BN partial sums.
# --------------------------------------------------------------------------------
def _conv_stats_kernel(x_ref, w_ref, y_ref, s_ref):
    # x_ref: (TM, Kp)  bf16 sign(activation) patches
    # w_ref: (Kp, Cp)  bf16 sign(bw)*sw weights
    # y_ref: (TM, Cp)  f32 conv output tile
    # s_ref: (1, 2, Cp) f32 per-tile [sum(y), sum(y^2)]
    y = jnp.dot(x_ref[...], w_ref[...], preferred_element_type=jnp.float32)
    y_ref[...] = y
    ssum = jnp.sum(y, axis=0, keepdims=True)         # (1, Cp)
    ssq = jnp.sum(y * y, axis=0, keepdims=True)      # (1, Cp)
    s_ref[...] = jnp.concatenate([ssum, ssq], axis=0)[None]


# --------------------------------------------------------------------------------
# Phase 2: BatchNorm (pre-folded per-channel scale/shift) + Hardtanh.
# --------------------------------------------------------------------------------
def _bn_hardtanh_kernel(y_ref, ss_ref, o_ref):
    # y_ref: (TM, Cp) f32; ss_ref: (2, Cp) f32 [scale; shift]; o_ref: (TM, Cp) f32
    scale = ss_ref[0:1, :]
    shift = ss_ref[1:2, :]
    o_ref[...] = jnp.clip(y_ref[...] * scale + shift, -1.0, 1.0)


# --------------------------------------------------------------------------------
# JAX glue: IRConv2d weight transform, im2col, layout plumbing.
# --------------------------------------------------------------------------------
def _binarize_weights(w):
    # IRConv2d (1w1a) weight transform; torch .std() is unbiased (ddof=1).
    cout = w.shape[0]
    wf = w.reshape(cout, -1)
    bw = wf - jnp.mean(wf, axis=-1, keepdims=True)
    bw = bw / jnp.std(bw, axis=-1, ddof=1, keepdims=True)
    sw = jnp.exp2(jnp.round(jnp.log2(jnp.mean(jnp.abs(bw), axis=-1, keepdims=True))))
    bwq = jnp.sign(bw) * sw                # +-sw, sw a power of two -> exact in bf16
    return bwq.reshape(w.shape)


def _im2col(x_nhwc, kh, kw, stride, pad):
    # Input is already sign()-ed, so zero padding == conv's zero padding of the
    # binarized activations (sign(0) == 0).
    n, h, w, c = x_nhwc.shape
    xp = jnp.pad(x_nhwc, ((0, 0), (pad, pad), (pad, pad), (0, 0)))
    ho = (h + 2 * pad - kh) // stride + 1
    wo = (w + 2 * pad - kw) // stride + 1
    cols = []
    for i in range(kh):
        for j in range(kw):
            cols.append(
                xp[:, i:i + stride * (ho - 1) + 1:stride,
                      j:j + stride * (wo - 1) + 1:stride, :]
            )
    cols = jnp.stack(cols, axis=3)                   # (N, HO, WO, KH*KW, Cin)
    return cols.reshape(n * ho * wo, kh * kw * c), ho, wo


@functools.partial(jax.jit, static_argnames=("stride", "tile_m"))
def convalg_forward(x_nchw, weight, gamma, beta, stride=1, tile_m=512):
    n, cin, h, w = x_nchw.shape
    cout, _, kh, kw = weight.shape

    # ---- activation binarization BEFORE im2col (1x input, narrow dtype) ----
    x_nhwc = jnp.transpose(x_nchw, (0, 2, 3, 1)).astype(jnp.float32)
    xb = jnp.sign(x_nhwc).astype(jnp.bfloat16)       # exact {-1, 0, +1}
    patches, ho, wo = _im2col(xb, kh, kw, stride, pad=1)     # (M, K) bf16

    # ---- weight binarization (parameter setup) ----
    w_bin = _binarize_weights(weight.astype(jnp.float32))
    # (Cout,Cin,KH,KW) -> (KH,KW,Cin,Cout) -> (K, Cout); row order matches im2col.
    w_mat = jnp.transpose(w_bin, (2, 3, 1, 0)).reshape(kh * kw * cin, cout)
    w_mat = w_mat.astype(jnp.bfloat16)               # +-sw exact in bf16

    m = n * ho * wo
    k = kh * kw * cin
    kp = _round_up(k, LANE)                          # lane-dense contraction
    cp = _round_up(cout, LANE)                       # lane-dense output (no vst.msk)
    tm = min(tile_m, _round_up(m, LANE))             # M tile (multiple of 128)
    mp = _round_up(m, tm)
    num_tiles = mp // tm

    # Zero padding: padded rows/cols contribute exactly 0 to y and to the BN sums.
    patches = jnp.pad(patches, ((0, mp - m), (0, kp - k)))
    w_pad = jnp.pad(w_mat, ((0, kp - k), (0, cp - cout)))

    cost1 = pl.CostEstimate(
        flops=int(2 * mp * kp * cp),
        transcendentals=0,
        bytes_accessed=int(mp * kp * 2 + kp * cp * 2 + mp * cp * 4
                           + num_tiles * 2 * cp * 4),
    )
    y2d, stats = pl.pallas_call(
        _conv_stats_kernel,
        out_shape=(
            jax.ShapeDtypeStruct((mp, cp), jnp.float32),
            jax.ShapeDtypeStruct((num_tiles, 2, cp), jnp.float32),
        ),
        grid=(num_tiles,),
        in_specs=[
            pl.BlockSpec((tm, kp), lambda i: (i, 0)),
            pl.BlockSpec((kp, cp), lambda i: (0, 0)),
        ],
        out_specs=(
            pl.BlockSpec((tm, cp), lambda i: (i, 0)),
            pl.BlockSpec((1, 2, cp), lambda i: (i, 0, 0)),
        ),
        compiler_params=pltpu.CompilerParams(dimension_semantics=("parallel",)),
        cost_estimate=cost1,
    )(patches, w_pad)

    # ---- fold BN batch stats + affine into one per-channel scale/shift ----
    sums = jnp.sum(stats, axis=0)                    # (2, Cp)
    mean = sums[0] / m                               # divide by TRUE M (pads add 0)
    var = jnp.maximum(sums[1] / m - mean * mean, 0.0)  # biased variance (BN training)
    inv = jax.lax.rsqrt(var + BN_EPS)
    gamma_p = jnp.pad(gamma.astype(jnp.float32), (0, cp - cout), constant_values=1.0)
    beta_p = jnp.pad(beta.astype(jnp.float32), (0, cp - cout))
    scale = gamma_p * inv
    shift = beta_p - mean * scale
    ss = jnp.stack([scale, shift], axis=0)           # (2, Cp)

    cost2 = pl.CostEstimate(
        flops=int(3 * mp * cp),
        transcendentals=0,
        bytes_accessed=int(2 * mp * cp * 4 + 2 * cp * 4),
    )
    out2d = pl.pallas_call(
        _bn_hardtanh_kernel,
        out_shape=jax.ShapeDtypeStruct((mp, cp), jnp.float32),
        grid=(num_tiles,),
        in_specs=[
            pl.BlockSpec((tm, cp), lambda i: (i, 0)),
            pl.BlockSpec((2, cp), lambda i: (0, 0)),
        ],
        out_specs=pl.BlockSpec((tm, cp), lambda i: (i, 0)),
        compiler_params=pltpu.CompilerParams(dimension_semantics=("parallel",)),
        cost_estimate=cost2,
    )(y2d, ss)

    out = out2d[:m, :cout].reshape(n, ho, wo, cout)
    return jnp.transpose(out, (0, 3, 1, 2))          # back to NCHW


# --------------------------------------------------------------------------------
# Pure-JAX reference (same semantics) for a correctness check.
# --------------------------------------------------------------------------------
def _reference(x, w, gamma, beta, stride=1):
    xb = jnp.sign(x.astype(jnp.float32))
    wb = _binarize_weights(w.astype(jnp.float32))
    y = jax.lax.conv_general_dilated(
        xb, wb, window_strides=(stride, stride), padding=((1, 1), (1, 1)),
        dimension_numbers=("NCHW", "OIHW", "NCHW"))
    mean = jnp.mean(y, axis=(0, 2, 3), keepdims=True)
    var = jnp.mean(jnp.square(y - mean), axis=(0, 2, 3), keepdims=True)
    yhat = (y - mean) * jax.lax.rsqrt(var + BN_EPS)
    yhat = yhat * gamma.reshape(1, -1, 1, 1) + beta.reshape(1, -1, 1, 1)
    return jnp.clip(yhat, -1.0, 1.0)


if __name__ == "__main__":
    key = jax.random.PRNGKey(0)
    k_x, k_w, k_g, k_b = jax.random.split(key, 4)

    N, CIN, COUT, H, W = 2, 4, 8, 16, 16
    x = jax.random.normal(k_x, (N, CIN, H, W), dtype=jnp.float32)
    w = jax.random.normal(k_w, (COUT, CIN, 3, 3), dtype=jnp.float32) * math.sqrt(
        2.0 / (CIN * 9))
    gamma = 1.0 + 0.1 * jax.random.normal(k_g, (COUT,), dtype=jnp.float32)
    beta = 0.1 * jax.random.normal(k_b, (COUT,), dtype=jnp.float32)

    # tile_m=128 -> 4 M-tiles so the multi-tile / cross-tile-BN path is exercised.
    y = convalg_forward(x, w, gamma, beta, stride=1, tile_m=128)
    y = jax.block_until_ready(y)
    assert y.shape == (N, COUT, H, W), y.shape

    y_ref = _reference(x, w, gamma, beta, stride=1)
    assert bool(jnp.all(jnp.isfinite(y)))
    assert bool(jnp.allclose(y, y_ref, atol=1e-3, rtol=1e-3)), float(
        jnp.max(jnp.abs(y - y_ref)))
    print("KERNEL_OK")
</pallas_src>

<mosaic_0001>
module attributes {stable_mosaic.version = 11 : i64} {
  func.func @_bn_hardtanh_kernel(%arg0: i32, %arg1: memref<128x128xf32, #tpu.memory_space<vmem>>, %arg2: memref<2x128xf32, #tpu.memory_space<vmem>>, %arg3: memref<128x128xf32, #tpu.memory_space<vmem>>) attributes {dimension_semantics = [#tpu.dimension_semantics<parallel>], iteration_bounds = array<i64: 4>, scalar_prefetch = 0 : i64, scratch_operands = 0 : i64, tpu.core_type = #tpu.core_type<tc>, window_params = [{transform_indices = @transform_0, window_bounds = array<i64: 128, 128>}, {pipeline_mode = #tpu.pipeline_mode<synchronous>, transform_indices = @transform_1, window_bounds = array<i64: 2, 128>}, {transform_indices = @transform_2, window_bounds = array<i64: 128, 128>}]} {
    %c0 = arith.constant 0 : index
    %c0_0 = arith.constant 0 : index
    %0 = vector.load %arg2[%c0, %c0_0] : memref<2x128xf32, #tpu.memory_space<vmem>>, vector<1x128xf32>
    %c1 = arith.constant 1 : index
    %c0_1 = arith.constant 0 : index
    %1 = vector.load %arg2[%c1, %c0_1] : memref<2x128xf32, #tpu.memory_space<vmem>>, vector<1x128xf32>
    %c0_2 = arith.constant 0 : index
    %c0_3 = arith.constant 0 : index
    %2 = vector.load %arg1[%c0_2, %c0_3] : memref<128x128xf32, #tpu.memory_space<vmem>>, vector<128x128xf32>
    %3 = vector.broadcast %0 : vector<1x128xf32> to vector<128x128xf32>
    %4 = arith.mulf %2, %3 : vector<128x128xf32>
    %5 = vector.broadcast %1 : vector<1x128xf32> to vector<128x128xf32>
    %6 = arith.addf %4, %5 : vector<128x128xf32>
    %cst = arith.constant -1.000000e+00 : f32
    %cst_4 = arith.constant 1.000000e+00 : f32
    %7 = vector.broadcast %cst : f32 to vector<128x128xf32>
    %8 = arith.maximumf %7, %6 : vector<128x128xf32>
    %9 = vector.broadcast %cst_4 : f32 to vector<128x128xf32>
    %10 = arith.minimumf %9, %8 : vector<128x128xf32>
    %c0_5 = arith.constant 0 : index
    %c0_6 = arith.constant 0 : index
    %11 = vector.load %arg3[%c0_5, %c0_6] : memref<128x128xf32, #tpu.memory_space<vmem>>, vector<128x128xf32>
    tpu.vector_store %arg3[%c0_5, %c0_6], %10 {strides = array<i32>} : memref<128x128xf32, #tpu.memory_space<vmem>>, vector<128x128xf32>,
    return
  }
  func.func @transform_0(%arg0: i32) -> (i32, i32) {
    %c0_i32 = arith.constant 0 : i32
    %c0_i32_0 = arith.constant 0 : i32
    return %arg0, %c0_i32 : i32, i32
  }
  func.func @transform_1(%arg0: i32) -> (i32, i32) {
    %c0_i32 = arith.constant 0 : i32
    %c0_i32_0 = arith.constant 0 : i32
    %c0_i32_1 = arith.constant 0 : i32
    return %c0_i32, %c0_i32_0 : i32, i32
  }
  func.func @transform_2(%arg0: i32) -> (i32, i32) {
    %c0_i32 = arith.constant 0 : i32
    %c0_i32_0 = arith.constant 0 : i32
    return %arg0, %c0_i32 : i32, i32
  }
}

module attributes {stable_mosaic.version = 11 : i64} {
  func.func @_conv_stats_kernel(%arg0: i32, %arg1: memref<128x128xbf16, #tpu.memory_space<vmem>>, %arg2: memref<128x128xbf16, #tpu.memory_space<vmem>>, %arg3: memref<128x128xf32, #tpu.memory_space<vmem>>, %arg4: memref<1x2x128xf32, #tpu.memory_space<vmem>>) attributes {dimension_semantics = [#tpu.dimension_semantics<parallel>], iteration_bounds = array<i64: 4>, scalar_prefetch = 0 : i64, scratch_operands = 0 : i64, tpu.core_type = #tpu.core_type<tc>, window_params = [{transform_indices = @transform_0, window_bounds = array<i64: 128, 128>}, {pipeline_mode = #tpu.pipeline_mode<synchronous>, transform_indices = @transform_1, window_bounds = array<i64: 128, 128>}, {transform_indices = @transform_2, window_bounds = array<i64: 128, 128>}, {transform_indices = @transform_3, window_bounds = array<i64: 1, 2, 128>}]} {
    %c0 = arith.constant 0 : index
    %c0_0 = arith.constant 0 : index
    %0 = vector.load %arg1[%c0, %c0_0] : memref<128x128xbf16, #tpu.memory_space<vmem>>, vector<128x128xbf16>
    %c0_1 = arith.constant 0 : index
    %c0_2 = arith.constant 0 : index
    %1 = vector.load %arg2[%c0_1, %c0_2] : memref<128x128xbf16, #tpu.memory_space<vmem>>, vector<128x128xbf16>
    %cst = arith.constant dense<0.000000e+00> : vector<128x128xf32>
    %2 = tpu.matmul %0, %1, %cst {dimension_numbers = #tpu.dot_dimension_numbers<[1], [0], [0], [1], [0, 0, 1, 1], [], []>} : vector<128x128xbf16>, vector<128x128xbf16>, vector<128x128xf32> -> vector<128x128xf32>
    %c0_3 = arith.constant 0 : index
    %c0_4 = arith.constant 0 : index
    %3 = vector.load %arg3[%c0_3, %c0_4] : memref<128x128xf32, #tpu.memory_space<vmem>>, vector<128x128xf32>
    tpu.vector_store %arg3[%c0_3, %c0_4], %2 {strides = array<i32>} : memref<128x128xf32, #tpu.memory_space<vmem>>, vector<128x128xf32>,
    %cst_5 = arith.constant dense<0.000000e+00> : vector<128xf32>
    %4 = vector.multi_reduction <add>, %2, %cst_5 [0] : vector<128x128xf32> to vector<128xf32>
    %5 = vector.shape_cast %4 : vector<128xf32> to vector<1x128xf32>
    %6 = arith.mulf %2, %2 : vector<128x128xf32>
    %cst_6 = arith.constant dense<0.000000e+00> : vector<128xf32>
    %7 = vector.multi_reduction <add>, %6, %cst_6 [0] : vector<128x128xf32> to vector<128xf32>
    %8 = vector.shape_cast %7 : vector<128xf32> to vector<1x128xf32>
    %9 = tpu.concatenate %5, %8 in 0 : vector<1x128xf32>, vector<1x128xf32> -> vector<2x128xf32>
    %10 = vector.shape_cast %9 : vector<2x128xf32> to vector<1x2x128xf32>
    %c0_7 = arith.constant 0 : index
    %c0_8 = arith.constant 0 : index
    %c0_9 = arith.constant 0 : index
    %11 = vector.load %arg4[%c0_7, %c0_8, %c0_9] : memref<1x2x128xf32, #tpu.memory_space<vmem>>, vector<1x2x128xf32>
    tpu.vector_store %arg4[%c0_7, %c0_8, %c0_9], %10 {strides = array<i32>} : memref<1x2x128xf32, #tpu.memory_space<vmem>>, vector<1x2x128xf32>,
    return
  }
  func.func @transform_0(%arg0: i32) -> (i32, i32) {
    %c0_i32 = arith.constant 0 : i32
    %c0_i32_0 = arith.constant 0 : i32
    return %arg0, %c0_i32 : i32, i32
  }
  func.func @transform_1(%arg0: i32) -> (i32, i32) {
    %c0_i32 = arith.constant 0 : i32
    %c0_i32_0 = arith.constant 0 : i32
    %c0_i32_1 = arith.constant 0 : i32
    return %c0_i32, %c0_i32_0 : i32, i32
  }
  func.func @transform_2(%arg0: i32) -> (i32, i32) {
    %c0_i32 = arith.constant 0 : i32
    %c0_i32_0 = arith.constant 0 : i32
    return %arg0, %c0_i32 : i32, i32
  }
  func.func @transform_3(%arg0: i32) -> (i32, i32, i32) {
    %c0_i32 = arith.constant 0 : i32
    %c0_i32_0 = arith.constant 0 : i32
    %c0_i32_1 = arith.constant 0 : i32
    return %arg0, %c0_i32, %c0_i32_0 : i32, i32, i32
  }
}

</mosaic_0001>

<bundles_post_ra>
// kernel: convalg_forward.3
= control target key start
LH: loop header
LB: loop body
LE: loop exit
PB: predicated region body
PF: predicated region fallthrough
CT: control target
= control target key end

     0   :  { %s369_s9 = smov 0   ;;  %s464_s0 = inlined_call_operand.vmem [shape: f32[512,128], index: 0, kind: input, shape index: {}]   ;;  %s465_s1 = inlined_call_operand.vmem [shape: f32[2,128], index: 1, kind: input, shape index: {}]   ;;  %s466_s2 = inlined_call_operand.vmem [shape: f32[512,128], index: 2, kind: output, shape index: {}]  }
   0x1 LB: > { %s309_s10 = sadd.s32 4294967295, %s352_s9   ;;  %p313_p0 = scmp.ge.s32.totalorder %s352_s9, 1  ;;  %s352_s9 = sphi %s369_s9, %s12_s9  }
   0x2   : > { %p113_p1 = scmp.lt.s32.totalorder %s352_s9, 5 }
   0x4   : > { %p114_p2 = pnand %p313_p0, %p113_p1 }
   0x5   : > { %s314_s11 = sshll.u32 (!%p114_p2), %s309_s10, 4 }
   0x6   : > { %117 = sbr.rel (%p114_p2) target bundleno = 32 (0x20), region = 28  ;;  %p136_p3 = scmp.lt.s32.totalorder (!%p114_p2), %s314_s11, 63 }
   0xb   : > { %s468_s11 = smov (!%p136_p3, %s314_s11), 63  ;;  %v380_v0 = vld [vmem:[%s465_s1] ss:$0 sm:$0xff]  ;;  %v390_v1 = vld [vmem:[%s465_s1 + $0x1] ss:$0 sm:$0xff] }
   0xc   : > { %s315_s12 = sshll.u32 %s468_s11, 3 }
   0xd   : > { %s385_s17 = scalar_lea.vmem %s464_s0, %s315_s12  ;;  %s413_s22 = scalar_lea.vmem %s466_s2, %s315_s12 }
   0xe   : > { %v149_v2 = vld [vmem:[%s385_s17] sm:$0xff]  ;;  %v150_v3 = vld [vmem:[%s385_s17 + $0x8] sm:$0xff]  ;;  %v151_v4 = vld [vmem:[%s385_s17 + $0x10] sm:$0xff] }
   0xf   : > { %v169_v5 = vmul.f32 %v380_v0, %v149_v2  ;;  %v170_v6 = vmul.f32 %v380_v0, %v150_v3  ;;  %v171_v7 = vmul.f32 %v380_v0, %v151_v4  ;;  %v152_v8 = vld [vmem:[%s385_s17 + $0x18] sm:$0xff]  ;;  %v153_v9 = vld [vmem:[%s385_s17 + $0x20] sm:$0xff]  ;;  %v154_v10 = vld [vmem:[%s385_s17 + $0x28] sm:$0xff] }
  0x10   : > { %v172_v11 = vmul.f32 %v380_v0, %v152_v8  ;;  %v173_v12 = vmul.f32 %v380_v0, %v153_v9  ;;  %v174_v13 = vmul.f32 %v380_v0, %v154_v10  ;;  %v155_v14 = vld [vmem:[%s385_s17 + $0x30] sm:$0xff]  ;;  %v156_v15 = vld [vmem:[%s385_s17 + $0x38] sm:$0xff]  ;;  %v157_v24 = vld [vmem:[%s385_s17 + $0x40] sm:$0xff] }
  0x11   : > { %v189_v16 = vadd.f32 %v390_v1, %v169_v5  ;;  %v190_v17 = vadd.f32 %v390_v1, %v170_v6  ;;  %v191_v18 = vadd.f32 %v390_v1, %v171_v7  ;;  %v175_v19 = vmul.f32 %v380_v0, %v155_v14  ;;  %v158_v25 = vld [vmem:[%s385_s17 + $0x48] sm:$0xff]  ;;  %v159_v26 = vld [vmem:[%s385_s17 + $0x50] sm:$0xff]  ;;  %v160_v31 = vld [vmem:[%s385_s17 + $0x58] sm:$0xff] }
  0x12   : > { %v192_v20 = vadd.f32 %v390_v1, %v172_v11  ;;  %v193_v21 = vadd.f32 %v390_v1, %v173_v12  ;;  %v194_v22 = vadd.f32 %v390_v1, %v174_v13  ;;  %v176_v23 = vmul.f32 %v380_v0, %v156_v15  ;;  %v161_v32 = vld [vmem:[%s385_s17 + $0x60] sm:$0xff]  ;;  %v162_v33 = vld [vmem:[%s385_s17 + $0x68] sm:$0xff]  ;;  %v163_v38 = vld [vmem:[%s385_s17 + $0x70] sm:$0xff] }
  0x13   : > { %v320_v27 = vclamps-f32 %v189_v16, 1.0  ;;  %v321_v28 = vclamps-f32 %v190_v17, 1.0  ;;  %v322_v29 = vclamps-f32 %v191_v18, 1.0  ;;  %v195_v30 = vadd.f32 %v390_v1, %v175_v19  ;;  %v164_v43 = vld [vmem:[%s385_s17 + $0x78] sm:$0xff] }
  0x14   : > { %v323_v34 = vclamps-f32 %v192_v20, 1.0  ;;  %v324_v35 = vclamps-f32 %v193_v21, 1.0  ;;  %v325_v36 = vclamps-f32 %v194_v22, 1.0  ;;  %v196_v37 = vadd.f32 %v390_v1, %v176_v23 }
  0x15   : > { %237 = vst [vmem:[%s413_s22] sm:$0xff] %v320_v27  ;;  %238 = vst [vmem:[%s413_s22 + $0x8] sm:$0xff] %v321_v28  ;;  %v326_v39 = vclamps-f32 %v195_v30, 1.0  ;;  %v177_v40 = vmul.f32 %v380_v0, %v157_v24  ;;  %v178_v41 = vmul.f32 %v380_v0, %v158_v25  ;;  %v179_v42 = vmul.f32 %v380_v0, %v159_v26 }
  0x16   : > { %239 = vst [vmem:[%s413_s22 + $0x10] sm:$0xff] %v322_v29  ;;  %240 = vst [vmem:[%s413_s22 + $0x18] sm:$0xff] %v323_v34  ;;  %v327_v44 = vclamps-f32 %v196_v37, 1.0  ;;  %v180_v45 = vmul.f32 %v380_v0, %v160_v31  ;;  %v181_v46 = vmul.f32 %v380_v0, %v161_v32  ;;  %v182_v47 = vmul.f32 %v380_v0, %v162_v33 }
  0x17   : > { %241 = vst [vmem:[%s413_s22 + $0x20] sm:$0xff] %v324_v35  ;;  %242 = vst [vmem:[%s413_s22 + $0x28] sm:$0xff] %v325_v36  ;;  %v197_v48 = vadd.f32 %v390_v1, %v177_v40  ;;  %v198_v49 = vadd.f32 %v390_v1, %v178_v41  ;;  %v199_v50 = vadd.f32 %v390_v1, %v179_v42 }
  0x18   : > { %243 = vst [vmem:[%s413_s22 + $0x30] sm:$0xff] %v326_v39  ;;  %v183_v51 = vmul.f32 %v380_v0, %v163_v38  ;;  %244 = vst [vmem:[%s413_s22 + $0x38] sm:$0xff] %v327_v44  ;;  %v200_v52 = vadd.f32 %v390_v1, %v180_v45  ;;  %v201_v53 = vadd.f32 %v390_v1, %v181_v46 }
  0x19   : > { %v202_v54 = vadd.f32 %v390_v1, %v182_v47  ;;  %v184_v55 = vmul.f32 %v380_v0, %v164_v43  ;;  %v328_v56 = vclamps-f32 %v197_v48, 1.0  ;;  %v329_v57 = vclamps-f32 %v198_v49, 1.0 }
  0x1a   : > { %v330_v58 = vclamps-f32 %v199_v50, 1.0  ;;  %v203_v59 = vadd.f32 %v390_v1, %v183_v51  ;;  %v331_v60 = vclamps-f32 %v200_v52, 1.0  ;;  %v332_v61 = vclamps-f32 %v201_v53, 1.0 }
  0x1b   : > { %v333_v62 = vclamps-f32 %v202_v54, 1.0  ;;  %v204_v63 = vadd.f32 %v390_v1, %v184_v55  ;;  %245 = vst [vmem:[%s413_s22 + $0x40] sm:$0xff] %v328_v56  ;;  %246 = vst [vmem:[%s413_s22 + $0x48] sm:$0xff] %v329_v57 }
  0x1c   : > { %247 = vst [vmem:[%s413_s22 + $0x50] sm:$0xff] %v330_v58  ;;  %v334_v2 = vclamps-f32 %v203_v59, 1.0  ;;  %248 = vst [vmem:[%s413_s22 + $0x58] sm:$0xff] %v331_v60 }
  0x1d   : > { %249 = vst [vmem:[%s413_s22 + $0x60] sm:$0xff] %v332_v61  ;;  %250 = vst [vmem:[%s413_s22 + $0x68] sm:$0xff] %v333_v62  ;;  %v335_v0 = vclamps-f32 %v204_v63, 1.0 }
  0x1e   : > { %251 = vst [vmem:[%s413_s22 + $0x70] sm:$0xff] %v334_v2 }
  0x1f   : > { %252 = vst [vmem:[%s413_s22 + $0x78] sm:$0xff] %v335_v0 }
  0x20 PF: > { %s12_s9 = sadd.s32 1, %s352_s9  }
  0x21   : > { %p9_p4 = scmp.ge.s32.totalorder %s12_s9, 6  }
  0x23   :  { %11 = sbr.rel (!%p9_p4) target bundleno = 1 (0x1), region = 58 }

// kernel: convalg_forward.2
= control target key start
LH: loop header
LB: loop body
LE: loop exit
PB: predicated region body
PF: predicated region fallthrough
CT: control target
= control target key end

     0   :  { %s719_s12 = smov 0   ;;  %s800_s0 = inlined_call_operand.vmem [shape: bf16[512,128], index: 0, kind: input, shape index: {}]   ;;  %s801_s1 = inlined_call_operand.vmem [shape: bf16[128,128], index: 1, kind: input, shape index: {}]   ;;  %s802_s2 = inlined_call_operand.vmem [shape: f32[512,128], index: 2, kind: output, shape index: {0}]   ;;  %s803_s3 = inlined_call_operand.vmem [shape: f32[4,2,128], index: 3, kind: output, shape index: {1}]  }
   0x1 LB: > { %s725_s13 = sadd.s32 4294967295, %s697_s12   ;;  %p579_p0 = scmp.ge.s32.totalorder %s697_s12, 1  ;;  %s697_s12 = sphi %s719_s12, %s14_s12  }
   0x2   : > { %p141_p1 = scmp.lt.s32.totalorder %s697_s12, 5 }
   0x4   : > { %p142_p2 = pnand %p579_p0, %p141_p1 }
   0x5   : > { %s580_s16 = sshll.u32 (!%p142_p2), %s725_s13, 4  ;;  %p181_p4 = scmp.lt.s32.totalorder (!%p142_p2), %s725_s13, 3 }
   0x6   : > { %145 = sbr.rel (%p142_p2) target bundleno = 289 (0x121), region = 28  ;;  %p170_p3 = scmp.lt.s32.totalorder (!%p142_p2), %s580_s16, 63 }
   0xb   : > { %v675_v0 = vld [vmem:[%s801_s1 + $0x38] sm:$0xff]   ;;  %v676_v1 = vld [vmem:[%s801_s1 + $0x30] sm:$0xff]   ;;  %s805_s16 = smov (!%p170_p3, %s580_s16), 63  ;;  %v677_v2 = vld [vmem:[%s801_s1 + $0x28] sm:$0xff]   ;;  %s807_s13 = smov (!%p181_p4, %s725_s13), 3  ;;  %vm485_vm0 = vcmask 1040384  }
   0xc   : > { %619 = vmatprep.subr.bf16.mxu0 %v675_v0  ;;  %651 = vmatprep.subr.bf16.mxu1 %v675_v0  ;;  %s581_s21 = sshll.u32 %s805_s16, 2  ;;  %v678_v3 = vld [vmem:[%s801_s1 + $0x20] sm:$0xff]   ;;  %v679_v5 = vld [vmem:[%s801_s1 + $0x18] sm:$0xff]   ;;  %v680_v7 = vld [vmem:[%s801_s1 + $0x10] sm:$0xff]   ;;  %s583_s8 = sshll.u32 %s805_s16, 3 }
   0xd   : > { %620 = vmatpush3.bf16.msra.mxu0 %v675_v0  ;;  %659 = vmatpush3.bf16.msra.mxu1 %v675_v0  ;;  %s745_s24 = scalar_lea.vmem %s800_s0, %s581_s21  ;;  %v681_v8 = vld [vmem:[%s801_s1 + $0x8] sm:$0xff]   ;;  %v682_v9 = vld [vmem:[%s801_s1] sm:$0xff]   ;;  %s774_s11 = scalar_lea.vmem %s802_s2, %s583_s8 }
   0xe   : > { %621 = vmatprep.subr.bf16.mxu0 %v676_v1  ;;  %652 = vmatprep.subr.bf16.mxu1 %v676_v1  ;;  %v683_v4 = vld [vmem:[%s745_s24] sm:$0xff]   ;;  %v684_v10 = vld [vmem:[%s745_s24 + $0x8] sm:$0xff]   ;;  %v685_v12 = vld [vmem:[%s745_s24 + $0x10] sm:$0xff]   ;;  %s584_s14 = sshll.u32 %s807_s13, 1 }
   0xf   : > { %635 = vmatprep.mubr.bf16.mxu0 %v683_v4  ;;  %v687_v6 = vld [vmem:[%s745_s24 + $0x20] sm:$0xff]   ;;  %v688_v11 = vld [vmem:[%s745_s24 + $0x28] sm:$0xff]   ;;  %v689_v13 = vld [vmem:[%s745_s24 + $0x30] sm:$0xff]   ;;  %s184_s17 = scalar_lea.vmem %s803_s3, %s584_s14 }
  0x10   : > { %643 = vmatprep.mubr.bf16.mxu1 %v687_v6  ;;  %v686_v14 = vld [vmem:[%s745_s24 + $0x18] sm:$0xff]  }
  0x11   : > { %622 = vmatpush3.bf16.msra.mxu0 %v676_v1  ;;  %660 = vmatpush3.bf16.msra.mxu1 %v676_v1  ;;  %v690_v15 = vld [vmem:[%s745_s24 + $0x38] sm:$0xff]  }
  0x12   : > { %623 = vmatprep.subr.bf16.mxu0 %v677_v2  ;;  %653 = vmatprep.subr.bf16.mxu1 %v677_v2 }
  0x15   : > { %624 = vmatpush3.bf16.msra.mxu0 %v677_v2  ;;  %661 = vmatpush3.bf16.msra.mxu1 %v677_v2 }
  0x16   : > { %625 = vmatprep.subr.bf16.mxu0 %v678_v3  ;;  %654 = vmatprep.subr.bf16.mxu1 %v678_v3 }
  0x19   : > { %626 = vmatpush3.bf16.msra.mxu0 %v678_v3  ;;  %662 = vmatpush3.bf16.msra.mxu1 %v678_v3 }
  0x1a   : > { %627 = vmatprep.subr.bf16.mxu0 %v679_v5  ;;  %655 = vmatprep.subr.bf16.mxu1 %v679_v5 }
  0x1d   : > { %628 = vmatpush3.bf16.msra.mxu0 %v679_v5  ;;  %663 = vmatpush3.bf16.msra.mxu1 %v679_v5 }
  0x1e   : > { %629 = vmatprep.subr.bf16.mxu0 %v680_v7  ;;  %656 = vmatprep.subr.bf16.mxu1 %v680_v7 }
  0x21   : > { %630 = vmatpush3.bf16.msra.mxu0 %v680_v7  ;;  %664 = vmatpush3.bf16.msra.mxu1 %v680_v7 }
  0x22   : > { %631 = vmatprep.subr.bf16.mxu0 %v681_v8  ;;  %657 = vmatprep.subr.bf16.mxu1 %v681_v8 }
  0x25   : > { %632 = vmatpush3.bf16.msra.mxu0 %v681_v8  ;;  %665 = vmatpush3.bf16.msra.mxu1 %v681_v8 }
  0x26   : > { %633 = vmatprep.subr.bf16.mxu0 %v682_v9  ;;  %658 = vmatprep.subr.bf16.mxu1 %v682_v9 }
  0x29   : > { %634 = vmatpush3.bf16.msra.mxu0 %v682_v9  ;;  %666 = vmatpush3.bf16.msra.mxu1 %v682_v9 }
  0x2c   : > { %636 = vmatmul.mubr.bf16.vlgmr.msra.gmra.mxu0 %v684_v10  ;;  %644 = vmatmul.mubr.bf16.vlgmr.msra.gmra.mxu1 %v688_v11 }
  0x2d   : > { %639 = vmatprep.mubr.bf16.mxu0 %v685_v12  ;;  %647 = vmatprep.mubr.bf16.mxu1 %v689_v13 }
  0x34   : > { %640 = vmatmul.mubr.bf16.gmra.mxu0 %v686_v14  ;;  %648 = vmatmul.mubr.bf16.gmra.mxu1 %v690_v15 }
  0xec   : > { %v637_v16 = vpop.f32.mrf.mxu0  ;;  %v645_v17 = vpop.f32.mrf.mxu1 }
  0xed   : > { %413 = vst [vmem:[%s774_s11 + $0x10] sm:$0xff] %v637_v16  ;;  %421 = vst [vmem:[%s774_s11 + $0x50] sm:$0xff] %v645_v17  ;;  %v450_v29 = vmul.f32 %v637_v16, %v637_v16  ;;  %v458_v59 = vmul.f32 %v645_v17, %v645_v17 }
  0xee   : > { %v348_v18 = vpop.f32.mrf.mxu0  ;;  %v380_v19 = vpop.f32.mrf.mxu1 }
  0xef   : > { %411 = vst [vmem:[%s774_s11] sm:$0xff] %v348_v18  ;;  %419 = vst [vmem:[%s774_s11 + $0x40] sm:$0xff] %v380_v19  ;;  %v448_v24 = vmul.f32 %v348_v18, %v348_v18  ;;  %v456_v53 = vmul.f32 %v380_v19, %v380_v19 }
  0xf0   : > { %v638_v20 = vpop.f32.mrf.mxu0  ;;  %v646_v21 = vpop.f32.mrf.mxu1 }
  0xf1   : > { %414 = vst [vmem:[%s774_s11 + $0x18] sm:$0xff] %v638_v20  ;;  %422 = vst [vmem:[%s774_s11 + $0x58] sm:$0xff] %v646_v21  ;;  %v451_v34 = vmul.f32 %v638_v20, %v638_v20  ;;  %v459_v62 = vmul.f32 %v646_v21, %v646_v21 }
  0xf2   : > { %v351_v22 = vpop.f32.mrf.mxu0  ;;  %v383_v23 = vpop.f32.mrf.mxu1 }
  0xf3   : > { %412 = vst [vmem:[%s774_s11 + $0x8] sm:$0xff] %v351_v22  ;;  %v427_v25 = vadd.f32 %v351_v22, %v348_v18  ;;  %v449_v26 = vmul.f32 %v351_v22, %v351_v22  ;;  %420 = vst [vmem:[%s774_s11 + $0x48] sm:$0xff] %v383_v23  ;;  %v457_v57 = vmul.f32 %v383_v23, %v383_v23 }
  0xf4   : > { %v641_v27 = vpop.f32.mrf.mxu0  ;;  %v649_v28 = vpop.f32.mrf.mxu1 }
  0xf5   : > { %v428_v30 = vadd.f32 %v637_v16, %v427_v25  ;;  %v464_v31 = vadd.f32 %v449_v26, %v448_v24  ;;  %417 = vst [vmem:[%s774_s11 + $0x30] sm:$0xff] %v641_v27  ;;  %425 = vst [vmem:[%s774_s11 + $0x70] sm:$0xff] %v649_v28  ;;  %v454_v47 = vmul.f32 %v641_v27, %v641_v27 }
  0xf6   : > { %v364_v32 = vpop.f32.mrf.mxu0  ;;  %v396_v33 = vpop.f32.mrf.mxu1  ;;  %v462_v7 = vmul.f32 %v649_v28, %v649_v28 }
  0xf7   : > { %v465_v35 = vadd.f32 %v464_v31, %v450_v29  ;;  %415 = vst [vmem:[%s774_s11 + $0x20] sm:$0xff] %v364_v32  ;;  %v429_v36 = vadd.f32 %v638_v20, %v428_v30  ;;  %423 = vst [vmem:[%s774_s11 + $0x60] sm:$0xff] %v396_v33  ;;  %v452_v40 = vmul.f32 %v364_v32, %v364_v32 }
  0xf8   : > { %v642_v37 = vpop.f32.mrf.mxu0  ;;  %v650_v38 = vpop.f32.mrf.mxu1  ;;  %v460_v2 = vmul.f32 %v396_v33, %v396_v33 }
  0xf9   : > { %v430_v39 = vadd.f32 %v429_v36, %v364_v32  ;;  %v466_v41 = vadd.f32 %v465_v35, %v451_v34  ;;  %418 = vst [vmem:[%s774_s11 + $0x38] sm:$0xff] %v642_v37  ;;  %426 = vst [vmem:[%s774_s11 + $0x78] sm:$0xff] %v650_v38  ;;  %v455_v50 = vmul.f32 %v642_v37, %v642_v37 }
  0xfa   : > { %v367_v42 = vpop.f32.mrf.mxu0  ;;  %v399_v43 = vpop.f32.mrf.mxu1  ;;  %v463_v10 = vmul.f32 %v650_v38, %v650_v38 }
  0xfb   : > { %v467_v44 = vadd.f32 %v466_v41, %v452_v40  ;;  %416 = vst [vmem:[%s774_s11 + $0x28] sm:$0xff] %v367_v42  ;;  %v431_v45 = vadd.f32 %v430_v39, %v367_v42  ;;  %v453_v46 = vmul.f32 %v367_v42, %v367_v42  ;;  %424 = vst [vmem:[%s774_s11 + $0x68] sm:$0xff] %v399_v43 }
  0xfc   : > { %v461_v6 = vmul.f32 %v399_v43, %v399_v43 }
  0xfd   : > { %v432_v48 = vadd.f32 %v641_v27, %v431_v45  ;;  %v468_v49 = vadd.f32 %v467_v44, %v453_v46 }
  0xff   : > { %v433_v51 = vadd.f32 %v642_v37, %v432_v48  ;;  %v469_v52 = vadd.f32 %v468_v49, %v454_v47 }
 0x101   : > { %v470_v54 = vadd.f32 %v469_v52, %v455_v50  ;;  %v434_v55 = vadd.f32 %v433_v51, %v380_v19 }
 0x103   : > { %v435_v56 = vadd.f32 %v434_v55, %v383_v23  ;;  %v471_v58 = vadd.f32 %v470_v54, %v456_v53 }
 0x105   : > { %v436_v60 = vadd.f32 %v645_v17, %v435_v56  ;;  %v472_v61 = vadd.f32 %v471_v58, %v457_v57 }
 0x107   : > { %v473_v63 = vadd.f32 %v472_v61, %v458_v59  ;;  %v437_v0 = vadd.f32 %v646_v21, %v436_v60 }
 0x109   : > { %v438_v1 = vadd.f32 %v437_v0, %v396_v33  ;;  %v474_v3 = vadd.f32 %v473_v63, %v459_v62 }
 0x10b   : > { %v475_v4 = vadd.f32 %v474_v3, %v460_v2  ;;  %v439_v5 = vadd.f32 %v438_v1, %v399_v43 }
 0x10d   : > { %v440_v8 = vadd.f32 %v649_v28, %v439_v5  ;;  %v476_v9 = vadd.f32 %v475_v4, %v461_v6 }
 0x10f   : > { %v441_v11 = vadd.f32 %v650_v38, %v440_v8  ;;  %v477_v12 = vadd.f32 %v476_v9, %v462_v7 }
 0x111   : > { %v442_v13 = vrot.slane %v441_v11, 4  ;;  %v478_v14 = vadd.f32 %v477_v12, %v463_v10 }
 0x113   : > { %v443_v15 = vadd.f32 %v442_v13, %v441_v11  ;;  %v479_v16 = vrot.slane %v478_v14, 4 }
 0x115   : > { %v444_v17 = vrot.slane %v443_v15, 2  ;;  %v480_v18 = vadd.f32 %v479_v16, %v478_v14 }
 0x117   : > { %v445_v19 = vadd.f32 %v444_v17, %v443_v15  ;;  %v481_v20 = vrot.slane %v480_v18, 2 }
 0x119   : > { %v446_v21 = vrot.slane %v445_v19, 1  ;;  %v482_v22 = vadd.f32 %v481_v20, %v480_v18 }
 0x11b   : > { %v483_v23 = vrot.slane %v482_v22, 1  ;;  %v447_v24 = vadd.f32 %v446_v21, %v445_v19 }
 0x11d   : > { %v484_v25 = vadd.f32 %v483_v23, %v482_v22 }
 0x11f   : > { %v486_v26 = vsel %vm485_vm0, %v447_v24, %v484_v25 }
 0x120   : > { %487 = vst [vmem:[%s184_s17] sm:$0x3] %v486_v26 }
 0x121 PF: > { %s14_s12 = sadd.s32 1, %s697_s12  }
 0x122   : > { %p11_p5 = scmp.ge.s32.totalorder %s14_s12, 6  }
 0x124   :  { %13 = sbr.rel (!%p11_p5) target bundleno = 1 (0x1), region = 70 }

</bundles_post_ra>
